<compile_context>
chip_gen: v7x
topology: tpu7x:2x2x1
jax: 0.10.0
libtpu: 0.0.40
codegen_flags: <defaults>
</compile_context>

<pallas_src>
import math

import jax
import jax.numpy as jnp
from jax.experimental import pallas as pl
from jax.experimental.pallas import tpu as pltpu

_SHIFT = math.log(2.0)

_LANE_WIDTHS = (1024, 512, 256, 128)  # candidate slab widths (lane-dense, unmasked)
_TARGET_TILE_BYTES = 4 << 20          # ~4 MiB per tile (per perf review, v7x-friendly)
_MIN_GRID = 4                         # min pipeline steps when rows allow it
_SMALL_FALLBACK = 1 << 18             # below ~256K elements fused XLA wins


def _shifted_softplus_kernel(x_ref, o_ref):
    """Numerically stable softplus(x) - log(2): max(x,0) + log1p(exp(-|x|)) - log(2)."""
    x = x_ref[...]
    if x_ref.dtype != jnp.dtype(jnp.bfloat16):
        # f32 path (also used for f32 inputs on all chips / anything non-bf16).
        x = x.astype(jnp.float32)
    # bf16 inputs stay in bf16: on v6e/v7x the bf16 EUP path doubles
    # transcendental throughput, and the kernel is EUP-bound with bf16 I/O.
    sp = jnp.maximum(x, 0) + jnp.log1p(jnp.exp(-jnp.abs(x)))
    o_ref[...] = (sp - _SHIFT).astype(o_ref.dtype)


def _choose_row_block(rows, max_rb):
    """Rows per grid step: multiple of 8 (or the full extent), capped so the
    grid has at least _MIN_GRID steps whenever `rows` allows it."""
    if rows < 8 * _MIN_GRID:
        return rows                       # single small block; full-extent block is legal
    rb = min(max_rb, rows // _MIN_GRID)   # guarantees cdiv(rows, rb) >= _MIN_GRID
    return max(8, (rb // 8) * 8)


def _pallas_slab(x2d):
    """Run the kernel over a lane-dense (rows, width) slab."""
    rows, width = x2d.shape
    itemsize = x2d.dtype.itemsize
    max_rb = max(8, (_TARGET_TILE_BYTES // (width * itemsize)) // 8 * 8)
    rb = _choose_row_block(rows, max_rb)
    grid = (pl.cdiv(rows, rb),)           # partial last block masked by Pallas

    # State the VMEM budget explicitly: 2 operands x 2 buffers x tile + margin.
    tile_bytes = rb * width * itemsize
    vmem_limit = min(4 * tile_bytes + (4 << 20), 48 << 20)

    n = rows * width
    cost = pl.CostEstimate(
        flops=5 * n,                      # max, abs, neg, add, sub
        transcendentals=2 * n,            # exp + log1p (EUP slot)
        bytes_accessed=2 * n * itemsize,
    )
    return pl.pallas_call(
        _shifted_softplus_kernel,
        out_shape=jax.ShapeDtypeStruct((rows, width), x2d.dtype),
        grid=grid,
        in_specs=[pl.BlockSpec((rb, width), lambda i: (i, 0))],
        out_specs=pl.BlockSpec((rb, width), lambda i: (i, 0)),
        compiler_params=pltpu.CompilerParams(
            dimension_semantics=("parallel",),
            vmem_limit_bytes=int(vmem_limit),
        ),
        cost_estimate=cost,
    )(x2d)


def _shifted_softplus_xla(x):
    """Fused-XLA fallback for tiny tensors and ragged tails."""
    y = jax.nn.softplus(x.astype(jnp.float32)) - _SHIFT
    return y.astype(x.dtype)


def _pick_lane_width(n):
    for w in _LANE_WIDTHS:
        if n % w == 0:
            return w
    return None


def shifted_softplus(x, *, small_fallback_elems=_SMALL_FALLBACK):
    """Applies softplus(x) - log(2) elementwise (Pallas TPU kernel)."""
    n = x.size
    if n == 0:
        return x
    if n < small_fallback_elems:
        # Launch + pipeline setup dominates tiny tensors; fused XLA is already
        # at the HBM roofline for a pure elementwise op.
        return _shifted_softplus_xla(x)

    flat = x.reshape(-1)
    width = _pick_lane_width(n)
    if width is not None:
        # Aligned case: no pad, no slice, no concat -> zero extra HBM passes.
        out = _pallas_slab(flat.reshape(-1, width))
        return out.reshape(x.shape)

    # Ragged total: lane-aligned prefix through Pallas, <128-element tail
    # through XLA (no full-array pad/slice round trip).
    width = _LANE_WIDTHS[0]
    prefix_n = (n // width) * width
    if prefix_n == 0:
        return _shifted_softplus_xla(x)
    prefix = _pallas_slab(flat[:prefix_n].reshape(-1, width)).reshape(-1)
    tail = _shifted_softplus_xla(flat[prefix_n:])
    return jnp.concatenate([prefix, tail]).reshape(x.shape)


if __name__ == "__main__":
    key = jax.random.PRNGKey(0)
    k1, k2, k3, k4, k5 = jax.random.split(key, 5)

    cases = []
    # Node-feature matrix as heanet's ShiftedSoftplus sees it (nodes, hidden);
    # force the Pallas path even though it is below the default fallback size.
    x_feat = jax.random.normal(k1, (128, 64), dtype=jnp.float32) * 3.0
    cases.append((x_feat, dict(small_fallback_elems=0), 1e-5))
    # Mid-size f32: default dispatch -> aligned Pallas path with grid >= 4.
    x_mid = jax.random.normal(k2, (512, 1024), dtype=jnp.float32) * 3.0
    cases.append((x_mid, {}, 1e-5))
    # bf16: bf16 transcendental path (EUP lever on v6e/v7x).
    x_bf16 = (jax.random.normal(k3, (256, 2048), dtype=jnp.float32) * 3.0).astype(jnp.bfloat16)
    cases.append((x_bf16, {}, 2e-2))
    # Ragged element count: Pallas prefix + XLA tail + concat.
    x_rag = jax.random.normal(k4, (2049, 131), dtype=jnp.float32) * 3.0
    cases.append((x_rag, {}, 1e-5))
    # Tiny: XLA fast path.
    x_tiny = jax.random.normal(k5, (8, 32), dtype=jnp.float32) * 3.0
    cases.append((x_tiny, {}, 1e-5))

    for x, kwargs, tol in cases:
        y = shifted_softplus(x, **kwargs)
        jax.block_until_ready(y)
        assert y.shape == x.shape and y.dtype == x.dtype
        ref = jax.nn.softplus(x.astype(jnp.float32)) - _SHIFT
        rel_err = jnp.max(jnp.abs(y.astype(jnp.float32) - ref) / (1.0 + jnp.abs(ref)))
        assert rel_err < tol, (x.shape, str(x.dtype), float(rel_err))

    print("KERNEL_OK")
</pallas_src>

<mosaic_0001>
module attributes {stable_mosaic.version = 11 : i64} {
  func.func @_shifted_softplus_kernel(%arg0: i32, %arg1: memref<8x1024xf32, #tpu.memory_space<vmem>>, %arg2: memref<8x1024xf32, #tpu.memory_space<vmem>>) attributes {dimension_semantics = [#tpu.dimension_semantics<parallel>], iteration_bounds = array<i64: 1>, scalar_prefetch = 0 : i64, scratch_operands = 0 : i64, tpu.core_type = #tpu.core_type<tc>, window_params = [{transform_indices = @transform_0, window_bounds = array<i64: 8, 1024>}, {transform_indices = @transform_1, window_bounds = array<i64: 8, 1024>}]} {
    %c0 = arith.constant 0 : index
    %c0_0 = arith.constant 0 : index
    %0 = vector.load %arg1[%c0, %c0_0] : memref<8x1024xf32, #tpu.memory_space<vmem>>, vector<8x1024xf32>
    %cst = arith.constant 0.000000e+00 : f32
    %1 = vector.broadcast %cst : f32 to vector<8x1024xf32>
    %2 = arith.maximumf %0, %1 : vector<8x1024xf32>
    %3 = math.absf %0 : vector<8x1024xf32>
    %cst_1 = arith.constant 0.000000e+00 : f32
    %4 = vector.broadcast %cst_1 : f32 to vector<8x1024xf32>
    %5 = arith.subf %4, %3 : vector<8x1024xf32>
    %6 = math.exp %5 : vector<8x1024xf32>
    %7 = math.log1p %6 : vector<8x1024xf32>
    %8 = arith.addf %2, %7 : vector<8x1024xf32>
    %cst_2 = arith.constant 0.693147182 : f32
    %9 = vector.broadcast %cst_2 : f32 to vector<8x1024xf32>
    %10 = arith.subf %8, %9 : vector<8x1024xf32>
    %c0_3 = arith.constant 0 : index
    %c0_4 = arith.constant 0 : index
    %11 = vector.load %arg2[%c0_3, %c0_4] : memref<8x1024xf32, #tpu.memory_space<vmem>>, vector<8x1024xf32>
    tpu.vector_store %arg2[%c0_3, %c0_4], %10 {strides = array<i32>} : memref<8x1024xf32, #tpu.memory_space<vmem>>, vector<8x1024xf32>,
    return
  }
  func.func @transform_0(%arg0: i32) -> (i32, i32) {
    %c0_i32 = arith.constant 0 : i32
    %c0_i32_0 = arith.constant 0 : i32
    return %arg0, %c0_i32 : i32, i32
  }
  func.func @transform_1(%arg0: i32) -> (i32, i32) {
    %c0_i32 = arith.constant 0 : i32
    %c0_i32_0 = arith.constant 0 : i32
    return %arg0, %c0_i32 : i32, i32
  }
}

</mosaic_0001>

<bundles_post_ra>
// kernel: tpu_custom_call.1
= control target key start
LH: loop header
LB: loop body
LE: loop exit
PB: predicated region body
PF: predicated region fallthrough
CT: control target
= control target key end

     0   :  { %6 = vsyncpa [#allocation3], 0  ;;  %s398_s0 = inlined_call_operand.hbm [shape: f32[8,1024], index: 0, kind: input, shape index: {}]   ;;  %s399_s1 = inlined_call_operand.hbm [shape: f32[8,1024], index: 1, kind: output, shape index: {}]  }
   0x1   :  { %7 = vsyncpa [#allocation4], 0  ;;  %s270_s6 = smov [#allocation2]   ;;  %s222_s10 = scalar_lea.hbm %s398_s0, 1024 }
   0x2   :  { %s14_s7 = sshll.u32 %s270_s6, 4  ;;  %p223_p0 = scmp.ne.s32.totalorder %s398_s0, %s222_s10  ;;  %s15_s7 = int_to_ptr.vmem [resolvable:$true] %s14_s7 }
   0x3   :  { %p226_p1 = scmp.lt.u32.totalorder %s222_s10, %s398_s0 }
   0x5   :  { %p228_p2 = pnand %p226_p1, %p223_p0 }
   0x7   :  { %231 = shalt.err (!%p228_p2)
}
   0x8   :  { %s232_s15 = scalar_lea.vmem %s15_s7, 1024  ;;  %p237_p4 = scmp.lt.s32.totalorder %s15_s7, %s15_s7 }
   0x9   :  { %p233_p3 = scmp.ne.s32.totalorder %s15_s7, %s232_s15  ;;  %p238_p5 = scmp.lt.s32.totalorder %s232_s15, %s232_s15 }
   0xb   :  { %p239_p6 = por %p238_p5, %p237_p4 }
   0xd   :  { %p240_p7 = pnand %p239_p6, %p233_p3 }
   0xf   :  { %243 = shalt.err (!%p240_p7)
}
  0x10   :  { %17 = dma.hbm_to_vmem [thread:$0]  %s398_s0, 1024, %s15_s7, [#allocation3]  }
  0x11   :  { %266 = dma.done.wait [#allocation3], 1024  }
  0x12   :  { %267 = vsyncadd [#allocation3], 4294966272  ;;  %v294_v0 = vld [vmem:[#allocation2] sm:$0xff]  ;;  %v296_v1 = vld [vmem:[#allocation2 + $0x8] sm:$0xff]  ;;  %s271_s0 = smov [#allocation5]  }
  0x13   :  { %v298_v2 = vld [vmem:[#allocation2 + $0x10] sm:$0xff]  ;;  %v37_v3 = vand.u32 2147483647, %v294_v0  ;;  %v38_v4 = vand.u32 2147483647, %v296_v1  ;;  %v303_v6 = vld [vmem:[#allocation2 + $0x18] sm:$0xff] }
  0x14   :  { %v39_v5 = vand.u32 2147483647, %v298_v2  ;;  %v305_v7 = vld [vmem:[#allocation2 + $0x20] sm:$0xff]  ;;  %v40_v10 = vand.u32 2147483647, %v303_v6  ;;  %v308_v11 = vld [vmem:[#allocation2 + $0x28] sm:$0xff] }
  0x15   :  { %v45_v8 = vsub.f32 0.0, %v37_v3  ;;  %v46_v9 = vsub.f32 0.0, %v38_v4  ;;  %v41_v13 = vand.u32 2147483647, %v305_v7  ;;  %v311_v14 = vld [vmem:[#allocation2 + $0x30] sm:$0xff]  ;;  %v313_v15 = vld [vmem:[#allocation2 + $0x38] sm:$0xff] }
  0x16   :  { %v47_v12 = vsub.f32 0.0, %v39_v5  ;;  %v48_v18 = vsub.f32 0.0, %v40_v10  ;;  %v42_v21 = vand.u32 2147483647, %v308_v11  ;;  %v43_v23 = vand.u32 2147483647, %v311_v14 }
  0x17   :  { %v53_v16 = vmul.f32 1.442695, %v45_v8  ;;  %v55_v17 = vmul.f32 1.442695, %v46_v9  ;;  %v49_v20 = vsub.f32 0.0, %v41_v13  ;;  %v29_v42 = vmax.f32 %v294_v0, 0.0 }
  0x18   :  { %v57_v19 = vmul.f32 1.442695, %v47_v12  ;;  %v59_v22 = vmul.f32 1.442695, %v48_v18  ;;  %v44_v24 = vand.u32 2147483647, %v313_v15 }
  0x19   :  { %190 = vpow2.f32 %v53_v16  ;;  %v61_v25 = vmul.f32 1.442695, %v49_v20  ;;  %v50_v26 = vsub.f32 0.0, %v42_v21  ;;  %v51_v27 = vsub.f32 0.0, %v43_v23  ;;  %s171_s18 = sshll.u32 %s271_s0, 4  ;;  %s172_s18 = int_to_ptr.vmem [resolvable:$true] %s171_s18 }
  0x1a   :  { %192 = vpow2.f32 %v55_v17  ;;  %v52_v28 = vsub.f32 0.0, %v44_v24  ;;  %v30_v43 = vmax.f32 %v296_v1, 0.0  ;;  %v31_v47 = vmax.f32 %v298_v2, 0.0  ;;  %s244_s19 = scalar_lea.vmem %s172_s18, 1024  ;;  %p249_p9 = scmp.lt.s32.totalorder %s172_s18, %s172_s18 }
  0x1b   :  { %194 = vpow2.f32 %v57_v19  ;;  %v63_v29 = vmul.f32 1.442695, %v50_v26  ;;  %v65_v30 = vmul.f32 1.442695, %v51_v27  ;;  %v32_v49 = vmax.f32 %v303_v6, 0.0  ;;  %p245_p8 = scmp.ne.s32.totalorder %s172_s18, %s244_s19  ;;  %p250_p10 = scmp.lt.s32.totalorder %s244_s19, %s244_s19 }
  0x1c   :  { %196 = vpow2.f32 %v59_v22  ;;  %v67_v31 = vmul.f32 1.442695, %v52_v28  ;;  %v33_v56 = vmax.f32 %v305_v7, 0.0  ;;  %v34_v57 = vmax.f32 %v308_v11, 0.0 }
  0x1d   :  { %198 = vpow2.f32 %v61_v25  ;;  %v35_v62 = vmax.f32 %v311_v14, 0.0  ;;  %v36_v2 = vmax.f32 %v313_v15, 0.0  ;;  %p251_p11 = por %p250_p10, %p249_p9 }
  0x1e   :  { %200 = vpow2.f32 %v63_v29 }
  0x1f   :  { %202 = vpow2.f32 %v65_v30  ;;  %p252_p12 = pnand %p251_p11, %p245_p8 }
  0x20   :  { %204 = vpow2.f32 %v67_v31 }
  0x23   :  { %v191_v32 = vpop.eup %190 }
  0x24   :  { %v193_v33 = vpop.eup %192  ;;  %v69_v34 = vadd.f32 1.0, %v191_v32  ;;  %v72_v40 = vmul.f32 -0.5, %v191_v32  ;;  %v75_v46 = vand.u32 2147483647, %v191_v32 }
  0x25   :  { %v195_v35 = vpop.eup %194  ;;  %v78_v36 = vadd.f32 1.0, %v193_v33  ;;  %v81_v41 = vmul.f32 -0.5, %v193_v33  ;;  %v84_v51 = vand.u32 2147483647, %v193_v33 }
  0x26   :  { %v197_v37 = vpop.eup %196  ;;  %206 = vlog2.f32 %v69_v34  ;;  %v87_v38 = vadd.f32 1.0, %v195_v35  ;;  %v90_v48 = vmul.f32 -0.5, %v195_v35  ;;  %v73_v54 = vadd.f32 1.0, %v72_v40 }
  0x27   :  { %v199_v39 = vpop.eup %198  ;;  %208 = vlog2.f32 %v78_v36  ;;  %v96_v44 = vadd.f32 1.0, %v197_v37  ;;  %v99_v52 = vmul.f32 -0.5, %v197_v37  ;;  %v82_v55 = vadd.f32 1.0, %v81_v41 }
  0x28   :  { %210 = vlog2.f32 %v87_v38  ;;  %v320_v45 = vpop.eup %200  ;;  %v105_v53 = vadd.f32 1.0, %v199_v39  ;;  %v93_v59 = vand.u32 2147483647, %v195_v35  ;;  %v108_v60 = vmul.f32 -0.5, %v199_v39 }
  0x29   :  { %v324_v50 = vpop.eup %202  ;;  %212 = vlog2.f32 %v96_v44  ;;  %v114_v61 = vadd.f32 1.0, %v320_v45  ;;  %vm331_vm0 = vcmp.lt.f32.partialorder %v75_v46, 0.0004427343  ;;  %v91_v63 = vadd.f32 1.0, %v90_v48 }
  0x2a   :  { %v328_v58 = vpop.eup %204  ;;  %214 = vlog2.f32 %v105_v53  ;;  %v102_v0 = vand.u32 2147483647, %v197_v37  ;;  %v123_v1 = vadd.f32 1.0, %v324_v50  ;;  %vm336_vm1 = vcmp.lt.f32.partialorder %v84_v51, 0.0004427343 }
  0x2b   :  { %v100_v3 = vadd.f32 1.0, %v99_v52  ;;  %216 = vlog2.f32 %v114_v61  ;;  %v117_v4 = vmul.f32 -0.5, %v320_v45  ;;  %v74_v5 = vmul.f32 %v191_v32, %v73_v54 }
  0x2c   :  { %v111_v8 = vand.u32 2147483647, %v199_v39  ;;  %218 = vlog2.f32 %v123_v1  ;;  %v132_v9 = vadd.f32 1.0, %v328_v58  ;;  %v83_v12 = vmul.f32 %v193_v33, %v82_v55 }
  0x2d   :  { %vm342_vm2 = vcmp.lt.f32.partialorder %v93_v59, 0.0004427343  ;;  %v109_v16 = vadd.f32 1.0, %v108_v60  ;;  %v126_v17 = vmul.f32 -0.5, %v324_v50  ;;  %v92_v20 = vmul.f32 %v195_v35, %v91_v63 }
  0x2e   :  { %vm347_vm3 = vcmp.lt.f32.partialorder %v102_v0, 0.0004427343  ;;  %220 = vlog2.f32 %v132_v9  ;;  %v101_v24 = vmul.f32 %v197_v37, %v100_v3  ;;  %v118_v25 = vadd.f32 1.0, %v117_v4 }
  0x2f   :  { %v135_v26 = vmul.f32 -0.5, %v328_v58  ;;  %vm354_vm4 = vcmp.lt.f32.partialorder %v111_v8, 0.0004427343  ;;  %v120_v30 = vand.u32 2147483647, %v320_v45  ;;  %v110_v34 = vmul.f32 %v199_v39, %v109_v16 }
  0x30   :  { %v207_v10 = vpop.eup %206  ;;  %v127_v35 = vadd.f32 1.0, %v126_v17  ;;  %v129_v40 = vand.u32 2147483647, %v324_v50  ;;  %v119_v48 = vmul.f32 %v320_v45, %v118_v25  ;;  %v138_v39 = vand.u32 2147483647, %v328_v58 }
  0x31   :  { %v209_v18 = vpop.eup %208  ;;  %v71_v19 = vmul.f32 0.6931472, %v207_v10  ;;  %v136_v51 = vadd.f32 1.0, %v135_v26  ;;  %vm370_vm5 = vcmp.lt.f32.partialorder %v120_v30, 0.0004427343 }
  0x32   :  { %v211_v22 = vpop.eup %210  ;;  %v80_v23 = vmul.f32 0.6931472, %v209_v18  ;;  %v128_v45 = vmul.f32 %v324_v50, %v127_v35  ;;  %vm130_vm6 = vcmp.lt.f32.partialorder %v129_v40, 0.0004427343  ;;  %vm139_vm7 = vcmp.lt.f32.partialorder %v138_v39, 0.0004427343 }
  0x33   :  { %v77_v27 = vsel %vm331_vm0, %v74_v5, %v71_v19  ;;  %v89_v28 = vmul.f32 0.6931472, %v211_v22  ;;  %v213_v31 = vpop.eup %212  ;;  %v137_v0 = vmul.f32 %v328_v58, %v136_v51 }
  0x34   :  { %v141_v32 = vadd.f32 %v77_v27, %v29_v42  ;;  %v86_v33 = vsel %vm336_vm1, %v83_v12, %v80_v23  ;;  %v98_v38 = vmul.f32 0.6931472, %v213_v31  ;;  %v215_v41 = vpop.eup %214 }
  0x35   :  { %v142_v36 = vadd.f32 %v86_v33, %v30_v43  ;;  %v95_v37 = vsel %vm342_vm2, %v92_v20, %v89_v28  ;;  %v107_v53 = vmul.f32 0.6931472, %v215_v41  ;;  %v217_v43 = vpop.eup %216 }
  0x36   :  { %v180_v44 = vadd.f32 -0.6931472, %v141_v32  ;;  %v143_v46 = vadd.f32 %v95_v37, %v31_v47  ;;  %v104_v42 = vsel %vm347_vm3, %v101_v24, %v98_v38  ;;  %v219_v47 = vpop.eup %218  ;;  %v116_v61 = vmul.f32 0.6931472, %v217_v43 }
  0x37   :  { %v181_v52 = vadd.f32 -0.6931472, %v142_v36  ;;  %v144_v55 = vadd.f32 %v104_v42, %v32_v49  ;;  %v113_v60 = vsel %vm354_vm4, %v110_v34, %v107_v53  ;;  %v125_v49 = vmul.f32 0.6931472, %v219_v47 }
  0x38   :  { %157 = vst [vmem:[#allocation5] sm:$0xff] %v180_v44  ;;  %v182_v54 = vadd.f32 -0.6931472, %v143_v46  ;;  %v145_v6 = vadd.f32 %v113_v60, %v33_v56  ;;  %v221_v1 = vpop.eup %220  ;;  %v122_v50 = vsel %vm370_vm5, %v119_v48, %v116_v61 }
  0x39   :  { %158 = vst [vmem:[#allocation5 + $0x8] sm:$0xff] %v181_v52  ;;  %v183_v63 = vadd.f32 -0.6931472, %v144_v55  ;;  %v146_v14 = vadd.f32 %v122_v50, %v34_v57  ;;  %v131_v4 = vsel %vm130_vm6, %v128_v45, %v125_v49  ;;  %v134_v5 = vmul.f32 0.6931472, %v221_v1 }
  0x3a   :  { %159 = vst [vmem:[#allocation5 + $0x10] sm:$0xff] %v182_v54  ;;  %v184_v3 = vadd.f32 -0.6931472, %v145_v6  ;;  %v147_v8 = vadd.f32 %v131_v4, %v35_v62 }
  0x3b   :  { %160 = vst [vmem:[#allocation5 + $0x18] sm:$0xff] %v183_v63  ;;  %v185_v7 = vadd.f32 -0.6931472, %v146_v14  ;;  %v140_v56 = vsel %vm139_vm7, %v137_v0, %v134_v5 }
  0x3c   :  { %161 = vst [vmem:[#allocation5 + $0x20] sm:$0xff] %v184_v3  ;;  %v186_v58 = vadd.f32 -0.6931472, %v147_v8  ;;  %v148_v9 = vadd.f32 %v140_v56, %v36_v2 }
  0x3d   :  { %162 = vst [vmem:[#allocation5 + $0x28] sm:$0xff] %v185_v7 }
  0x3e   :  { %163 = vst [vmem:[#allocation5 + $0x30] sm:$0xff] %v186_v58  ;;  %v187_v10 = vadd.f32 -0.6931472, %v148_v9 }
  0x40   :  { %164 = vst [vmem:[#allocation5 + $0x38] sm:$0xff] %v187_v10 }
  0x41   :  { %255 = shalt.err (!%p252_p12)
}
  0x42   :  { %s256_s22 = scalar_lea.hbm %s399_s1, 1024 }
  0x43   :  { %p257_p13 = scmp.ne.s32.totalorder %s399_s1, %s256_s22  ;;  %p260_p0 = scmp.lt.u32.totalorder %s256_s22, %s399_s1 }
  0x45   :  { %p262_p1 = pnand %p260_p0, %p257_p13 }
  0x47   :  { %265 = shalt.err (!%p262_p1)
}
  0x48   :  { %174 = dma.vmem_to_hbm [thread:$0]  %s172_s18, 1024, %s399_s1, [#allocation4]  }
  0x49   :  { %268 = dma.done.wait [#allocation4], 1024  }
  0x4a   :  { %269 = vsyncadd [#allocation4], 4294966272 }
  0x4b   :  { %178 = vsyncpa [#allocation3], 1 }
  0x4c   :  { %179 = vsyncpa [#allocation4], 1 }

</bundles_post_ra>
